<compile_context>
chip_gen: v5e
topology: v5e:2x2
jax: 0.10.0
libtpu: 0.0.40
codegen_flags: <defaults>
</compile_context>

<pallas_src>
import numpy as np
import jax
import jax.numpy as jnp
from jax.experimental import pallas as pl
from jax.experimental.pallas import tpu as pltpu

# ---------------- ESPBlock configuration ----------------
B = 2
IN_CHANNELS = 8
OUT_CHANNELS = 8
KERNEL_SIZES = (3, 5)
SCALE_FACTORS = (1, 2)
USE_RESIDUAL = True
BN_EPS = 1e-3
H = 16
W = 16
HW = H * W

GROUPS = len(KERNEL_SIZES)
MID = OUT_CHANNELS // GROUPS                 # 4
RES = OUT_CHANNELS - GROUPS * MID            # 0
K0, K1 = KERNEL_SIZES
SF1 = SCALE_FACTORS[1]
HD, WD = H // SF1, W // SF1

BMID = MID * B                               # 8  (batch-outer mid rows)
CINB = IN_CHANNELS * B                       # 16
BOUT = OUT_CHANNELS * B                      # 16

assert RES == 0 and IN_CHANNELS == OUT_CHANNELS

# ---- packed parameter slab: (NR, HW) f32, one input DMA ----
# columns (rows 0..BOUT-1 hold per-row parameters, batch-outer row order)
C_W1 = 0                        # (BMID, CINB) grouped 1x1 + shuffle, kron(I_B, w)
C_WF = C_W1 + CINB              # (BOUT, BOUT) fused block-diag branch 1x1 convs
C_T0 = C_WF + BOUT              # 5 cols: branch-0 taps [ctr, v-1, v+1, h-1, h+1]
C_T1 = C_T0 + 5                 # 9 cols: branch-1 taps [ctr, v(-2,-1,1,2), h(-2,-1,1,2)]
C_FB0 = C_T1 + 9                # FDW bias / PReLU alpha columns
C_FA0 = C_FB0 + 1
C_FB1 = C_FA0 + 1
C_FA1 = C_FB1 + 1
C_PS = C_FA1 + 1                # preactivation scale / bias / alpha (BOUT rows)
C_PB = C_PS + 1
C_PA = C_PB + 1
assert C_PA < HW

# rows below the parameter rows: per-lane coefficient / mask / parity rows
R_CFW = BOUT                    # 3 rows: width-pass upsample coefs (shift -2, 0, +2)
R_CFH = R_CFW + 3               # 3 rows: height-pass upsample coefs
R_M0 = R_CFH + 3                # 4 rows: branch-0 masks [v-1, v+1, h-1, h+1]
R_M1 = R_M0 + 4                 # 8 rows: branch-1 masks [v(-2,-1,1,2), h(-2,-1,1,2)]
R_JE = R_M1 + 8                 # avgpool parity rows
R_JO = R_JE + 1
R_HE = R_JO + 1
R_HO = R_HE + 1
NR = ((R_HO + 1 + 7) // 8) * 8  # 40 (padded to a sublane multiple)

# TODO(synk): coefficient / mask / parity rows are generated for this exact
# (H, W, SCALE_FACTORS) config; regenerate them in lockstep if any changes.


# ---------------- in-kernel helpers ----------------
def _shift(x, s):
    """y[:, p] = x[:, (p + s) % N] (lane rotation; invalid lanes are masked)."""
    if s == 0:
        return x
    return pltpu.roll(x, (-s) % x.shape[-1], 1)


def esp_block_kernel(x_ref, p_ref, o_ref, f_scr):
    x = x_ref[...]                         # (B*CIN, HW), batch-outer channel rows
    p = p_ref[...]                         # (NR, HW) packed params / coefs / masks

    def col(n, c):                         # (n, 1) per-row parameter column
        return p[0:n, c:c + 1]

    def row(r):                            # (1, HW) per-lane coefficient row
        return p[r:r + 1, :]

    # 1) grouped 1x1 conv + channel shuffle (folded into weight), whole batch
    w1 = p[0:BMID, C_W1:C_W1 + CINB]
    y = jnp.dot(w1, x, preferred_element_type=jnp.float32)          # (BMID, HW)

    # 2) branch 0: FDW 3x3 (BN scales folded into taps) + PReLU
    acc0 = col(BMID, C_T0 + 0) * y
    acc0 = acc0 + col(BMID, C_T0 + 1) * (row(R_M0 + 0) * _shift(y, -W))
    acc0 = acc0 + col(BMID, C_T0 + 2) * (row(R_M0 + 1) * _shift(y, W))
    acc0 = acc0 + col(BMID, C_T0 + 3) * (row(R_M0 + 2) * _shift(y, -1))
    acc0 = acc0 + col(BMID, C_T0 + 4) * (row(R_M0 + 3) * _shift(y, 1))
    f0 = acc0 + col(BMID, C_FB0)
    f0 = jnp.where(f0 >= 0, f0, col(BMID, C_FA0) * f0)

    # 3) branch 1: AvgPool2d(2) kept 2x2-block-constant at full resolution
    #    (0.25 pool scale is folded into the branch-1 taps on the host)
    a = y + row(R_JE) * _shift(y, 1) + row(R_JO) * _shift(y, -1)
    a = a + row(R_HE) * _shift(a, W) + row(R_HO) * _shift(a, -W)

    #    FDW 5x5 on the 2x-downsampled grid (step-2 shifts) + PReLU
    acc1 = col(BMID, C_T1 + 0) * a
    for k, d in enumerate((-2, -1, 1, 2)):
        acc1 = acc1 + col(BMID, C_T1 + 1 + k) * (row(R_M1 + k) * _shift(a, 2 * d * W))
        acc1 = acc1 + col(BMID, C_T1 + 5 + k) * (row(R_M1 + 4 + k) * _shift(a, 2 * d))
    f1 = acc1 + col(BMID, C_FB1)
    f1 = jnp.where(f1 >= 0, f1, col(BMID, C_FA1) * f1)

    # 4) both branch 1x1 convs fused into one block-diagonal matmul
    f_scr[0:BMID, :] = f0
    f_scr[BMID:BOUT, :] = f1
    wf = p[0:BOUT, C_WF:C_WF + BOUT]
    z = jnp.dot(wf, f_scr[...], preferred_element_type=jnp.float32)  # (BOUT, HW)
    c0 = z[0:BMID]                          # branch-0 outputs (batch-outer mid rows)
    c1 = z[BMID:BOUT]                       # branch-1 outputs, pre-upsample

    # 5) bilinear x2 upsample (align_corners=True): 2 even-shift rolls per pass
    t = (row(R_CFW + 1) * c1
         + row(R_CFW) * _shift(c1, -2)
         + row(R_CFW + 2) * _shift(c1, 2))
    u = (row(R_CFH + 1) * t
         + row(R_CFH) * _shift(t, -2 * W)
         + row(R_CFH + 2) * _shift(t, 2 * W))

    # 6) residual + preactivation (BN + PReLU; branch BN biases folded into C_PB)
    def finish(core, lo):
        zz = core
        if USE_RESIDUAL:
            zz = zz + x[lo:lo + MID]        # x row index == output row index
        zz = p[lo:lo + MID, C_PS:C_PS + 1] * zz + p[lo:lo + MID, C_PB:C_PB + 1]
        return jnp.where(zz >= 0, zz, p[lo:lo + MID, C_PA:C_PA + 1] * zz)

    for b in range(B):                      # rows already in NCHW (batch-outer) order
        r0 = b * OUT_CHANNELS
        r1 = r0 + MID
        m0 = b * MID
        o_ref[r0:r0 + MID, :] = finish(c0[m0:m0 + MID], r0)
        o_ref[r1:r1 + MID, :] = finish(u[m0:m0 + MID], r1)


# ---------------- wrapper (no transposes; pure reshapes only) ----------------
@jax.jit
def esp_block_pallas(x_nchw, slab):
    b, cin, h, w = x_nchw.shape
    hw = h * w
    x2 = x_nchw.reshape(b * cin, hw)                    # no copy
    out2 = pl.pallas_call(
        esp_block_kernel,
        out_shape=jax.ShapeDtypeStruct((b * OUT_CHANNELS, hw), jnp.float32),
        grid_spec=pltpu.PrefetchScalarGridSpec(
            num_scalar_prefetch=0,
            grid=(1,),
            in_specs=[
                pl.BlockSpec((b * cin, hw), lambda i: (0, 0)),      # x
                pl.BlockSpec((NR, hw), lambda i: (0, 0)),           # packed slab
            ],
            out_specs=pl.BlockSpec((b * OUT_CHANNELS, hw), lambda i: (0, 0)),
            scratch_shapes=[pltpu.VMEM((BOUT, hw), jnp.float32)],
        ),
        compiler_params=pltpu.CompilerParams(dimension_semantics=("arbitrary",)),
    )(x2, slab)
    return out2.reshape(b, OUT_CHANNELS, h, w)          # no copy


# ---------------- deterministic parameter construction ----------------
def _bilinear_up_matrix(n_out, n_in):
    # align_corners=True bilinear (matches pytorchcv InterpolationBlock)
    m = np.zeros((n_out, n_in), np.float32)
    if n_out == 1 or n_in == 1:
        m[:, 0] = 1.0
        return m
    for i in range(n_out):
        src = i * (n_in - 1) / (n_out - 1)
        i0 = int(np.floor(src))
        i1 = min(i0 + 1, n_in - 1)
        f = src - i0
        m[i, i0] += 1.0 - f
        m[i, i1] += f
    return m


def _up_roll_coefs_even(n_out, n_in):
    """c[j, i] for shifts {-2, 0, +2}: on a 2x block-constant array bc
    (bc[2s] == bc[2s+1]), align_corners bilinear upsample is
        out[i] = sum_j c[j, i] * bc[i + 2*(j - 1)].
    Odd-shift references are folded onto even shifts via block-constancy."""
    co = np.zeros((3, n_out), np.float32)
    for i in range(n_out):
        src = 0.0 if (n_out == 1 or n_in == 1) else i * (n_in - 1) / (n_out - 1)
        i0 = int(np.floor(src))
        i1 = min(i0 + 1, n_in - 1)
        f = src - i0
        for idx, wgt in ((i0, 1.0 - f), (i1, f)):
            d = 2 * idx - i                     # bc index 2*idx == i + d
            if d % 2 != 0:                      # bc[i+d] == bc[i+d+1] (same block)
                d += 1
            assert d in (-2, 0, 2)
            co[d // 2 + 1, i] += wgt
    return co


def make_params(key):
    keys = iter(jax.random.split(key, 64))

    def nrm(shape, scale=0.2):
        return scale * jax.random.normal(next(keys), shape, jnp.float32)

    def uni(shape, lo, hi):
        return jax.random.uniform(next(keys), shape, jnp.float32, lo, hi)

    def fold_bn(c):
        gamma = uni((c, 1), 0.8, 1.2)
        beta = nrm((c, 1), 0.1)
        rmean = nrm((c, 1), 0.1)
        rvar = uni((c, 1), 0.5, 1.5)
        scale = gamma / jnp.sqrt(rvar + BN_EPS)
        bias = beta - rmean * scale
        return scale, bias

    # grouped 1x1 conv (torch weight shape (MID, CIN//GROUPS, 1, 1), bias=False)
    ipg = IN_CHANNELS // GROUPS
    opg = MID // GROUPS
    w_conv = nrm((MID, ipg))
    w1_bd = np.zeros((MID, IN_CHANNELS), np.float32)
    w_conv_np = np.asarray(w_conv)
    for o in range(MID):
        g = o // opg
        w1_bd[o, g * ipg:(g + 1) * ipg] = w_conv_np[o]
    # fold ChannelShuffle(channels=MID, groups=GROUPS) into output row order
    cpg = MID // GROUPS
    perm = np.arange(MID).reshape(GROUPS, cpg).T.reshape(-1)   # new -> old
    w1_eff = w1_bd[perm]                                       # (MID, CIN)

    def branch_params(ksize, c_in, c_out):
        wv = nrm((ksize, c_in, 1))
        wh = nrm((ksize, c_in, 1))
        sv, bv = fold_bn(c_in)
        sh, bh = fold_bn(c_in)
        alpha = uni((c_in, 1), 0.1, 0.3)
        pk = jnp.stack([sv, bv, sh, bh, alpha], axis=0)        # (5, c_in, 1)
        w2 = nrm((c_out, c_in))
        s2, b2 = fold_bn(c_out)
        bn2 = jnp.stack([s2, b2], axis=0)                      # (2, c_out, 1)
        return wv, wh, pk, w2, bn2

    wv0, wh0, pk0, w20, bn20 = branch_params(K0, MID, MID)
    wv1, wh1, pk1, w21, bn21 = branch_params(K1, MID, MID)

    # preactivation (BN + PReLU)
    sp, bp = fold_bn(OUT_CHANNELS)
    alpha_p = uni((OUT_CHANNELS, 1), 0.1, 0.3)
    pre = jnp.stack([sp, bp, alpha_p], axis=0)                 # (3, COUT, 1)

    # ---------- fold + pack for the kernel ----------
    def tile_b(v):                     # (C,) -> (C*B,), batch-OUTER row order
        return np.tile(np.asarray(v, np.float32).reshape(-1), B)

    def fold_branch(wv, wh, pk, w2, bn2, extra_scale=1.0):
        pk_np = np.asarray(pk)[:, :, 0]                        # (5, C)
        sv, bv, sh, bh, alpha = pk_np
        wv_eff = np.asarray(wv)[:, :, 0] * sv[None, :] * extra_scale
        wh_eff = np.asarray(wh)[:, :, 0] * sh[None, :] * extra_scale
        fdw_bias = bv + bh
        s2 = np.asarray(bn2)[0, :, 0]
        b2 = np.asarray(bn2)[1, :, 0]
        w2_eff = np.asarray(w2) * s2[:, None]                  # conv2 BN scale folded
        return wv_eff, wh_eff, fdw_bias, alpha, w2_eff, b2

    wv0e, wh0e, fb0, fa0, w20e, b20 = fold_branch(wv0, wh0, pk0, w20, bn20)
    # 0.25 AvgPool2d(2) scale folded into the branch-1 depthwise taps
    wv1e, wh1e, fb1, fa1, w21e, b21 = fold_branch(
        wv1, wh1, pk1, w21, bn21, extra_scale=1.0 / (SF1 * SF1))

    sp_np = np.asarray(sp)[:, 0]
    bp_np = np.asarray(bp)[:, 0]
    ap_np = np.asarray(alpha_p)[:, 0]
    br_bias = np.concatenate([b20, b21])                       # per out-channel BN bias
    pre_bias_eff = sp_np * br_bias + bp_np                     # fold through preact BN

    eye_b = np.eye(B, dtype=np.float32)
    slab = np.zeros((NR, HW), np.float32)
    # batch-outer block-diagonal weights
    slab[0:BMID, C_W1:C_W1 + CINB] = np.kron(eye_b, w1_eff)
    wf = np.zeros((BOUT, BOUT), np.float32)
    wf[0:BMID, 0:BMID] = np.kron(eye_b, w20e)
    wf[BMID:BOUT, BMID:BOUT] = np.kron(eye_b, w21e)
    slab[0:BOUT, C_WF:C_WF + BOUT] = wf
    # branch-0 tap columns (center tap combined)
    slab[0:BMID, C_T0 + 0] = tile_b(wv0e[1] + wh0e[1])
    slab[0:BMID, C_T0 + 1] = tile_b(wv0e[0])
    slab[0:BMID, C_T0 + 2] = tile_b(wv0e[2])
    slab[0:BMID, C_T0 + 3] = tile_b(wh0e[0])
    slab[0:BMID, C_T0 + 4] = tile_b(wh0e[2])
    # branch-1 tap columns
    slab[0:BMID, C_T1 + 0] = tile_b(wv1e[2] + wh1e[2])
    for k, t in enumerate((0, 1, 3, 4)):                       # taps d = -2, -1, +1, +2
        slab[0:BMID, C_T1 + 1 + k] = tile_b(wv1e[t])
        slab[0:BMID, C_T1 + 5 + k] = tile_b(wh1e[t])
    slab[0:BMID, C_FB0] = tile_b(fb0)
    slab[0:BMID, C_FA0] = tile_b(fa0)
    slab[0:BMID, C_FB1] = tile_b(fb1)
    slab[0:BMID, C_FA1] = tile_b(fa1)
    slab[0:BOUT, C_PS] = tile_b(sp_np)
    slab[0:BOUT, C_PB] = tile_b(pre_bias_eff)
    slab[0:BOUT, C_PA] = tile_b(ap_np)

    # per-lane coefficient / mask / parity rows
    jj = np.arange(HW) % W
    hh = np.arange(HW) // W
    jj2 = jj // 2
    hh2 = hh // 2
    cow = _up_roll_coefs_even(W, WD)                           # (3, W)
    coh = _up_roll_coefs_even(H, HD)                           # (3, H)
    slab[R_CFW:R_CFW + 3] = cow[:, jj]
    slab[R_CFH:R_CFH + 3] = coh[:, hh]
    slab[R_M0 + 0] = (hh >= 1)
    slab[R_M0 + 1] = (hh <= H - 2)
    slab[R_M0 + 2] = (jj >= 1)
    slab[R_M0 + 3] = (jj <= W - 2)
    for k, d in enumerate((-2, -1, 1, 2)):
        slab[R_M1 + k] = np.logical_and(hh2 + d >= 0, hh2 + d <= HD - 1)
        slab[R_M1 + 4 + k] = np.logical_and(jj2 + d >= 0, jj2 + d <= WD - 1)
    slab[R_JE] = (jj % 2 == 0)
    slab[R_JO] = (jj % 2 == 1)
    slab[R_HE] = (hh % 2 == 0)
    slab[R_HO] = (hh % 2 == 1)

    # raw (unfolded) params for the pure-JAX reference
    uh = _bilinear_up_matrix(H, HD)
    uw = _bilinear_up_matrix(W, WD)
    raw = dict(w_conv=w_conv,
               wv0=wv0[:, :, 0], wh0=wh0[:, :, 0], pk0=pk0, w20=w20, bn20=bn20,
               wv1=wv1[:, :, 0], wh1=wh1[:, :, 0], pk1=pk1, w21=w21, bn21=bn21,
               uh=jnp.asarray(uh), uw=jnp.asarray(uw), pre=pre)
    return jnp.asarray(slab), raw


# ---------------- pure-JAX reference (NCHW, eval-mode BN) ----------------
def reference_forward(x, raw):
    hi = jax.lax.Precision.HIGHEST
    b = x.shape[0]
    ipg = IN_CHANNELS // GROUPS
    opg = MID // GROUPS

    # grouped 1x1 conv
    ys = []
    for g in range(GROUPS):
        xg = x[:, g * ipg:(g + 1) * ipg]
        wg = raw['w_conv'][g * opg:(g + 1) * opg]
        ys.append(jnp.einsum('oc,bchw->bohw', wg, xg, precision=hi))
    y = jnp.concatenate(ys, axis=1)
    # channel shuffle
    cpg = MID // GROUPS
    y = y.reshape(b, GROUPS, cpg, H, W).transpose(0, 2, 1, 3, 4).reshape(b, MID, H, W)

    def dwconv(z, taps, axis):
        k = taps.shape[0]
        p = (k - 1) // 2
        pad = [(0, 0)] * 4
        pad[axis] = (p, p)
        zp = jnp.pad(z, pad)
        n = z.shape[axis]
        out = jnp.zeros_like(z)
        for t in range(k):
            sl = [slice(None)] * 4
            sl[axis] = slice(t, t + n)
            out = out + taps[t][None, :, None, None] * zp[tuple(sl)]
        return out

    def cb(a, c):
        return a.reshape(1, c, 1, 1)

    def fdw(z, wv, wh, pk):
        c = z.shape[1]
        v = dwconv(z, wv, 2) * cb(pk[0], c) + cb(pk[1], c)
        hh = dwconv(z, wh, 3) * cb(pk[2], c) + cb(pk[3], c)
        s = v + hh
        return jnp.where(s >= 0, s, cb(pk[4], c) * s)

    # branch 0
    b0 = fdw(y, raw['wv0'], raw['wh0'], raw['pk0'])
    b0 = jnp.einsum('oc,bchw->bohw', raw['w20'], b0, precision=hi)
    b0 = b0 * cb(raw['bn20'][0], MID) + cb(raw['bn20'][1], MID)

    # branch 1
    yd = y.reshape(b, MID, HD, SF1, WD, SF1).mean(axis=(3, 5))
    b1 = fdw(yd, raw['wv1'], raw['wh1'], raw['pk1'])
    b1 = jnp.einsum('oc,bchw->bohw', raw['w21'], b1, precision=hi)
    b1 = jnp.einsum('ih,bchw,jw->bcij', raw['uh'], b1, raw['uw'], precision=hi)
    b1 = b1 * cb(raw['bn21'][0], MID) + cb(raw['bn21'][1], MID)

    out = jnp.concatenate([b0, b1], axis=1)
    if USE_RESIDUAL:
        out = out + x
    out = out * cb(raw['pre'][0], OUT_CHANNELS) + cb(raw['pre'][1], OUT_CHANNELS)
    return jnp.where(out >= 0, out, cb(raw['pre'][2], OUT_CHANNELS) * out)


# ---------------- main ----------------
if __name__ == "__main__":
    key = jax.random.PRNGKey(0)
    kx, kp = jax.random.split(key)
    x = jax.random.normal(kx, (B, IN_CHANNELS, H, W), jnp.float32)
    slab, raw = make_params(kp)

    out = esp_block_pallas(x, slab)
    out = jax.block_until_ready(out)

    ref = reference_forward(x, raw)
    np.testing.assert_allclose(np.asarray(out), np.asarray(ref), rtol=1e-2, atol=1e-2)
    print("KERNEL_OK")
</pallas_src>

<mosaic_0001>
module attributes {stable_mosaic.version = 11 : i64} {
  func.func @esp_block_kernel(%arg0: i32, %arg1: memref<16x256xf32, #tpu.memory_space<vmem>>, %arg2: memref<40x256xf32, #tpu.memory_space<vmem>>, %arg3: memref<16x256xf32, #tpu.memory_space<vmem>>, %arg4: memref<16x256xf32, #tpu.memory_space<vmem>>) attributes {dimension_semantics = [#tpu.dimension_semantics<arbitrary>], iteration_bounds = array<i64: 1>, scalar_prefetch = 0 : i64, scratch_operands = 1 : i64, tpu.core_type = #tpu.core_type<tc>, window_params = [{pipeline_mode = #tpu.pipeline_mode<synchronous>, transform_indices = @transform_0, window_bounds = array<i64: 16, 256>}, {pipeline_mode = #tpu.pipeline_mode<synchronous>, transform_indices = @transform_1, window_bounds = array<i64: 40, 256>}, {pipeline_mode = #tpu.pipeline_mode<synchronous>, transform_indices = @transform_2, window_bounds = array<i64: 16, 256>}]} {
    %c0 = arith.constant 0 : index
    %c0_0 = arith.constant 0 : index
    %0 = vector.load %arg1[%c0, %c0_0] : memref<16x256xf32, #tpu.memory_space<vmem>>, vector<16x256xf32>
    %c0_1 = arith.constant 0 : index
    %c0_2 = arith.constant 0 : index
    %1 = vector.load %arg2[%c0_1, %c0_2] : memref<40x256xf32, #tpu.memory_space<vmem>>, vector<40x256xf32>
    %2 = vector.extract_strided_slice %1 {offsets = [0, 0], sizes = [8, 16], strides = [1, 1]} : vector<40x256xf32> to vector<8x16xf32>
    %cst = arith.constant dense<0.000000e+00> : vector<8x256xf32>
    %3 = tpu.matmul %2, %0, %cst {dimension_numbers = #tpu.dot_dimension_numbers<[1], [0], [0], [1], [0, 0, 1, 1], [], []>} : vector<8x16xf32>, vector<16x256xf32>, vector<8x256xf32> -> vector<8x256xf32>
    %4 = vector.extract_strided_slice %1 {offsets = [0, 32], sizes = [8, 1], strides = [1, 1]} : vector<40x256xf32> to vector<8x1xf32>
    %5 = vector.broadcast %4 : vector<8x1xf32> to vector<8x256xf32>
    %6 = arith.mulf %5, %3 : vector<8x256xf32>
    %7 = vector.extract_strided_slice %1 {offsets = [0, 33], sizes = [8, 1], strides = [1, 1]} : vector<40x256xf32> to vector<8x1xf32>
    %8 = vector.extract_strided_slice %1 {offsets = [22, 0], sizes = [1, 256], strides = [1, 1]} : vector<40x256xf32> to vector<1x256xf32>
    %c16_i32 = arith.constant 16 : i32
    %9 = tpu.dynamic_rotate %3 by %c16_i32 dim 1 : vector<8x256xf32>, i32 -> vector<8x256xf32>
    %10 = vector.broadcast %8 : vector<1x256xf32> to vector<8x256xf32>
    %11 = arith.mulf %10, %9 : vector<8x256xf32>
    %12 = vector.broadcast %7 : vector<8x1xf32> to vector<8x256xf32>
    %13 = arith.mulf %12, %11 : vector<8x256xf32>
    %14 = arith.addf %6, %13 : vector<8x256xf32>
    %15 = vector.extract_strided_slice %1 {offsets = [0, 34], sizes = [8, 1], strides = [1, 1]} : vector<40x256xf32> to vector<8x1xf32>
    %16 = vector.extract_strided_slice %1 {offsets = [23, 0], sizes = [1, 256], strides = [1, 1]} : vector<40x256xf32> to vector<1x256xf32>
    %c240_i32 = arith.constant 240 : i32
    %17 = tpu.dynamic_rotate %3 by %c240_i32 dim 1 : vector<8x256xf32>, i32 -> vector<8x256xf32>
    %18 = vector.broadcast %16 : vector<1x256xf32> to vector<8x256xf32>
    %19 = arith.mulf %18, %17 : vector<8x256xf32>
    %20 = vector.broadcast %15 : vector<8x1xf32> to vector<8x256xf32>
    %21 = arith.mulf %20, %19 : vector<8x256xf32>
    %22 = arith.addf %14, %21 : vector<8x256xf32>
    %23 = vector.extract_strided_slice %1 {offsets = [0, 35], sizes = [8, 1], strides = [1, 1]} : vector<40x256xf32> to vector<8x1xf32>
    %24 = vector.extract_strided_slice %1 {offsets = [24, 0], sizes = [1, 256], strides = [1, 1]} : vector<40x256xf32> to vector<1x256xf32>
    %c1_i32 = arith.constant 1 : i32
    %25 = tpu.dynamic_rotate %3 by %c1_i32 dim 1 : vector<8x256xf32>, i32 -> vector<8x256xf32>
    %26 = vector.broadcast %24 : vector<1x256xf32> to vector<8x256xf32>
    %27 = arith.mulf %26, %25 : vector<8x256xf32>
    %28 = vector.broadcast %23 : vector<8x1xf32> to vector<8x256xf32>
    %29 = arith.mulf %28, %27 : vector<8x256xf32>
    %30 = arith.addf %22, %29 : vector<8x256xf32>
    %31 = vector.extract_strided_slice %1 {offsets = [0, 36], sizes = [8, 1], strides = [1, 1]} : vector<40x256xf32> to vector<8x1xf32>
    %32 = vector.extract_strided_slice %1 {offsets = [25, 0], sizes = [1, 256], strides = [1, 1]} : vector<40x256xf32> to vector<1x256xf32>
    %c255_i32 = arith.constant 255 : i32
    %33 = tpu.dynamic_rotate %3 by %c255_i32 dim 1 : vector<8x256xf32>, i32 -> vector<8x256xf32>
    %34 = vector.broadcast %32 : vector<1x256xf32> to vector<8x256xf32>
    %35 = arith.mulf %34, %33 : vector<8x256xf32>
    %36 = vector.broadcast %31 : vector<8x1xf32> to vector<8x256xf32>
    %37 = arith.mulf %36, %35 : vector<8x256xf32>
    %38 = arith.addf %30, %37 : vector<8x256xf32>
    %39 = vector.extract_strided_slice %1 {offsets = [0, 46], sizes = [8, 1], strides = [1, 1]} : vector<40x256xf32> to vector<8x1xf32>
    %40 = vector.broadcast %39 : vector<8x1xf32> to vector<8x256xf32>
    %41 = arith.addf %38, %40 : vector<8x256xf32>
    %cst_3 = arith.constant 0.000000e+00 : f32
    %42 = vector.broadcast %cst_3 : f32 to vector<8x256xf32>
    %43 = arith.cmpf oge, %41, %42 : vector<8x256xf32>
    %44 = vector.extract_strided_slice %1 {offsets = [0, 47], sizes = [8, 1], strides = [1, 1]} : vector<40x256xf32> to vector<8x1xf32>
    %45 = vector.broadcast %44 : vector<8x1xf32> to vector<8x256xf32>
    %46 = arith.mulf %45, %41 : vector<8x256xf32>
    %47 = arith.select %43, %41, %46 : vector<8x256xi1>, vector<8x256xf32>
    %48 = vector.extract_strided_slice %1 {offsets = [34, 0], sizes = [1, 256], strides = [1, 1]} : vector<40x256xf32> to vector<1x256xf32>
    %c255_i32_4 = arith.constant 255 : i32
    %49 = tpu.dynamic_rotate %3 by %c255_i32_4 dim 1 : vector<8x256xf32>, i32 -> vector<8x256xf32>
    %50 = vector.broadcast %48 : vector<1x256xf32> to vector<8x256xf32>
    %51 = arith.mulf %50, %49 : vector<8x256xf32>
    %52 = arith.addf %3, %51 : vector<8x256xf32>
    %53 = vector.extract_strided_slice %1 {offsets = [35, 0], sizes = [1, 256], strides = [1, 1]} : vector<40x256xf32> to vector<1x256xf32>
    %c1_i32_5 = arith.constant 1 : i32
    %54 = tpu.dynamic_rotate %3 by %c1_i32_5 dim 1 : vector<8x256xf32>, i32 -> vector<8x256xf32>
    %55 = vector.broadcast %53 : vector<1x256xf32> to vector<8x256xf32>
    %56 = arith.mulf %55, %54 : vector<8x256xf32>
    %57 = arith.addf %52, %56 : vector<8x256xf32>
    %58 = vector.extract_strided_slice %1 {offsets = [36, 0], sizes = [1, 256], strides = [1, 1]} : vector<40x256xf32> to vector<1x256xf32>
    %c240_i32_6 = arith.constant 240 : i32
    %59 = tpu.dynamic_rotate %57 by %c240_i32_6 dim 1 : vector<8x256xf32>, i32 -> vector<8x256xf32>
    %60 = vector.broadcast %58 : vector<1x256xf32> to vector<8x256xf32>
    %61 = arith.mulf %60, %59 : vector<8x256xf32>
    %62 = arith.addf %57, %61 : vector<8x256xf32>
    %63 = vector.extract_strided_slice %1 {offsets = [37, 0], sizes = [1, 256], strides = [1, 1]} : vector<40x256xf32> to vector<1x256xf32>
    %c16_i32_7 = arith.constant 16 : i32
    %64 = tpu.dynamic_rotate %57 by %c16_i32_7 dim 1 : vector<8x256xf32>, i32 -> vector<8x256xf32>
    %65 = vector.broadcast %63 : vector<1x256xf32> to vector<8x256xf32>
    %66 = arith.mulf %65, %64 : vector<8x256xf32>
    %67 = arith.addf %62, %66 : vector<8x256xf32>
    %68 = vector.extract_strided_slice %1 {offsets = [0, 37], sizes = [8, 1], strides = [1, 1]} : vector<40x256xf32> to vector<8x1xf32>
    %69 = vector.broadcast %68 : vector<8x1xf32> to vector<8x256xf32>
    %70 = arith.mulf %69, %67 : vector<8x256xf32>
    %71 = vector.extract_strided_slice %1 {offsets = [0, 38], sizes = [8, 1], strides = [1, 1]} : vector<40x256xf32> to vector<8x1xf32>
    %72 = vector.extract_strided_slice %1 {offsets = [26, 0], sizes = [1, 256], strides = [1, 1]} : vector<40x256xf32> to vector<1x256xf32>
    %c64_i32 = arith.constant 64 : i32
    %73 = tpu.dynamic_rotate %67 by %c64_i32 dim 1 : vector<8x256xf32>, i32 -> vector<8x256xf32>
    %74 = vector.broadcast %72 : vector<1x256xf32> to vector<8x256xf32>
    %75 = arith.mulf %74, %73 : vector<8x256xf32>
    %76 = vector.broadcast %71 : vector<8x1xf32> to vector<8x256xf32>
    %77 = arith.mulf %76, %75 : vector<8x256xf32>
    %78 = arith.addf %70, %77 : vector<8x256xf32>
    %79 = vector.extract_strided_slice %1 {offsets = [0, 42], sizes = [8, 1], strides = [1, 1]} : vector<40x256xf32> to vector<8x1xf32>
    %80 = vector.extract_strided_slice %1 {offsets = [30, 0], sizes = [1, 256], strides = [1, 1]} : vector<40x256xf32> to vector<1x256xf32>
    %c4_i32 = arith.constant 4 : i32
    %81 = tpu.dynamic_rotate %67 by %c4_i32 dim 1 : vector<8x256xf32>, i32 -> vector<8x256xf32>
    %82 = vector.broadcast %80 : vector<1x256xf32> to vector<8x256xf32>
    %83 = arith.mulf %82, %81 : vector<8x256xf32>
    %84 = vector.broadcast %79 : vector<8x1xf32> to vector<8x256xf32>
    %85 = arith.mulf %84, %83 : vector<8x256xf32>
    %86 = arith.addf %78, %85 : vector<8x256xf32>
    %87 = vector.extract_strided_slice %1 {offsets = [0, 39], sizes = [8, 1], strides = [1, 1]} : vector<40x256xf32> to vector<8x1xf32>
    %88 = vector.extract_strided_slice %1 {offsets = [27, 0], sizes = [1, 256], strides = [1, 1]} : vector<40x256xf32> to vector<1x256xf32>
    %c32_i32 = arith.constant 32 : i32
    %89 = tpu.dynamic_rotate %67 by %c32_i32 dim 1 : vector<8x256xf32>, i32 -> vector<8x256xf32>
    %90 = vector.broadcast %88 : vector<1x256xf32> to vector<8x256xf32>
    %91 = arith.mulf %90, %89 : vector<8x256xf32>
    %92 = vector.broadcast %87 : vector<8x1xf32> to vector<8x256xf32>
    %93 = arith.mulf %92, %91 : vector<8x256xf32>
    %94 = arith.addf %86, %93 : vector<8x256xf32>
    %95 = vector.extract_strided_slice %1 {offsets = [0, 43], sizes = [8, 1], strides = [1, 1]} : vector<40x256xf32> to vector<8x1xf32>
    %96 = vector.extract_strided_slice %1 {offsets = [31, 0], sizes = [1, 256], strides = [1, 1]} : vector<40x256xf32> to vector<1x256xf32>
    %c2_i32 = arith.constant 2 : i32
    %97 = tpu.dynamic_rotate %67 by %c2_i32 dim 1 : vector<8x256xf32>, i32 -> vector<8x256xf32>
    %98 = vector.broadcast %96 : vector<1x256xf32> to vector<8x256xf32>
    %99 = arith.mulf %98, %97 : vector<8x256xf32>
    %100 = vector.broadcast %95 : vector<8x1xf32> to vector<8x256xf32>
    %101 = arith.mulf %100, %99 : vector<8x256xf32>
    %102 = arith.addf %94, %101 : vector<8x256xf32>
    %103 = vector.extract_strided_slice %1 {offsets = [0, 40], sizes = [8, 1], strides = [1, 1]} : vector<40x256xf32> to vector<8x1xf32>
    %104 = vector.extract_strided_slice %1 {offsets = [28, 0], sizes = [1, 256], strides = [1, 1]} : vector<40x256xf32> to vector<1x256xf32>
    %c224_i32 = arith.constant 224 : i32
    %105 = tpu.dynamic_rotate %67 by %c224_i32 dim 1 : vector<8x256xf32>, i32 -> vector<8x256xf32>
    %106 = vector.broadcast %104 : vector<1x256xf32> to vector<8x256xf32>
    %107 = arith.mulf %106, %105 : vector<8x256xf32>
    %108 = vector.broadcast %103 : vector<8x1xf32> to vector<8x256xf32>
    %109 = arith.mulf %108, %107 : vector<8x256xf32>
    %110 = arith.addf %102, %109 : vector<8x256xf32>
    %111 = vector.extract_strided_slice %1 {offsets = [0, 44], sizes = [8, 1], strides = [1, 1]} : vector<40x256xf32> to vector<8x1xf32>
    %112 = vector.extract_strided_slice %1 {offsets = [32, 0], sizes = [1, 256], strides = [1, 1]} : vector<40x256xf32> to vector<1x256xf32>
    %c254_i32 = arith.constant 254 : i32
    %113 = tpu.dynamic_rotate %67 by %c254_i32 dim 1 : vector<8x256xf32>, i32 -> vector<8x256xf32>
    %114 = vector.broadcast %112 : vector<1x256xf32> to vector<8x256xf32>
    %115 = arith.mulf %114, %113 : vector<8x256xf32>
    %116 = vector.broadcast %111 : vector<8x1xf32> to vector<8x256xf32>
    %117 = arith.mulf %116, %115 : vector<8x256xf32>
    %118 = arith.addf %110, %117 : vector<8x256xf32>
    %119 = vector.extract_strided_slice %1 {offsets = [0, 41], sizes = [8, 1], strides = [1, 1]} : vector<40x256xf32> to vector<8x1xf32>
    %120 = vector.extract_strided_slice %1 {offsets = [29, 0], sizes = [1, 256], strides = [1, 1]} : vector<40x256xf32> to vector<1x256xf32>
    %c192_i32 = arith.constant 192 : i32
    %121 = tpu.dynamic_rotate %67 by %c192_i32 dim 1 : vector<8x256xf32>, i32 -> vector<8x256xf32>
    %122 = vector.broadcast %120 : vector<1x256xf32> to vector<8x256xf32>
    %123 = arith.mulf %122, %121 : vector<8x256xf32>
    %124 = vector.broadcast %119 : vector<8x1xf32> to vector<8x256xf32>
    %125 = arith.mulf %124, %123 : vector<8x256xf32>
    %126 = arith.addf %118, %125 : vector<8x256xf32>
    %127 = vector.extract_strided_slice %1 {offsets = [0, 45], sizes = [8, 1], strides = [1, 1]} : vector<40x256xf32> to vector<8x1xf32>
    %128 = vector.extract_strided_slice %1 {offsets = [33, 0], sizes = [1, 256], strides = [1, 1]} : vector<40x256xf32> to vector<1x256xf32>
    %c252_i32 = arith.constant 252 : i32
    %129 = tpu.dynamic_rotate %67 by %c252_i32 dim 1 : vector<8x256xf32>, i32 -> vector<8x256xf32>
    %130 = vector.broadcast %128 : vector<1x256xf32> to vector<8x256xf32>
    %131 = arith.mulf %130, %129 : vector<8x256xf32>
    %132 = vector.broadcast %127 : vector<8x1xf32> to vector<8x256xf32>
    %133 = arith.mulf %132, %131 : vector<8x256xf32>
    %134 = arith.addf %126, %133 : vector<8x256xf32>
    %135 = vector.extract_strided_slice %1 {offsets = [0, 48], sizes = [8, 1], strides = [1, 1]} : vector<40x256xf32> to vector<8x1xf32>
    %136 = vector.broadcast %135 : vector<8x1xf32> to vector<8x256xf32>
    %137 = arith.addf %134, %136 : vector<8x256xf32>
    %cst_8 = arith.constant 0.000000e+00 : f32
    %138 = vector.broadcast %cst_8 : f32 to vector<8x256xf32>
    %139 = arith.cmpf oge, %137, %138 : vector<8x256xf32>
    %140 = vector.extract_strided_slice %1 {offsets = [0, 49], sizes = [8, 1], strides = [1, 1]} : vector<40x256xf32> to vector<8x1xf32>
    %141 = vector.broadcast %140 : vector<8x1xf32> to vector<8x256xf32>
    %142 = arith.mulf %141, %137 : vector<8x256xf32>
    %143 = arith.select %139, %137, %142 : vector<8x256xi1>, vector<8x256xf32>
    %c0_9 = arith.constant 0 : index
    %c0_10 = arith.constant 0 : index
    %144 = vector.load %arg4[%c0_9, %c0_10] : memref<16x256xf32, #tpu.memory_space<vmem>>, vector<8x256xf32>
    tpu.vector_store %arg4[%c0_9, %c0_10], %47 {strides = array<i32>} : memref<16x256xf32, #tpu.memory_space<vmem>>, vector<8x256xf32>,
    %c8 = arith.constant 8 : index
    %c0_11 = arith.constant 0 : index
    %145 = vector.load %arg4[%c8, %c0_11] : memref<16x256xf32, #tpu.memory_space<vmem>>, vector<8x256xf32>
    tpu.vector_store %arg4[%c8, %c0_11], %143 {strides = array<i32>} : memref<16x256xf32, #tpu.memory_space<vmem>>, vector<8x256xf32>,
    %146 = vector.extract_strided_slice %1 {offsets = [0, 16], sizes = [16, 16], strides = [1, 1]} : vector<40x256xf32> to vector<16x16xf32>
    %c0_12 = arith.constant 0 : index
    %c0_13 = arith.constant 0 : index
    %147 = vector.load %arg4[%c0_12, %c0_13] : memref<16x256xf32, #tpu.memory_space<vmem>>, vector<16x256xf32>
    %cst_14 = arith.constant dense<0.000000e+00> : vector<16x256xf32>
    %148 = tpu.matmul %146, %147, %cst_14 {dimension_numbers = #tpu.dot_dimension_numbers<[1], [0], [0], [1], [0, 0, 1, 1], [], []>} : vector<16x16xf32>, vector<16x256xf32>, vector<16x256xf32> -> vector<16x256xf32>
    %149 = vector.extract_strided_slice %148 {offsets = [0, 0], sizes = [8, 256], strides = [1, 1]} : vector<16x256xf32> to vector<8x256xf32>
    %150 = vector.extract_strided_slice %148 {offsets = [8, 0], sizes = [8, 256], strides = [1, 1]} : vector<16x256xf32> to vector<8x256xf32>
    %151 = vector.extract_strided_slice %1 {offsets = [17, 0], sizes = [1, 256], strides = [1, 1]} : vector<40x256xf32> to vector<1x256xf32>
    %152 = vector.broadcast %151 : vector<1x256xf32> to vector<8x256xf32>
    %153 = arith.mulf %152, %150 : vector<8x256xf32>
    %154 = vector.extract_strided_slice %1 {offsets = [16, 0], sizes = [1, 256], strides = [1, 1]} : vector<40x256xf32> to vector<1x256xf32>
    %c2_i32_15 = arith.constant 2 : i32
    %155 = tpu.dynamic_rotate %150 by %c2_i32_15 dim 1 : vector<8x256xf32>, i32 -> vector<8x256xf32>
    %156 = vector.broadcast %154 : vector<1x256xf32> to vector<8x256xf32>
    %157 = arith.mulf %156, %155 : vector<8x256xf32>
    %158 = arith.addf %153, %157 : vector<8x256xf32>
    %159 = vector.extract_strided_slice %1 {offsets = [18, 0], sizes = [1, 256], strides = [1, 1]} : vector<40x256xf32> to vector<1x256xf32>
    %c254_i32_16 = arith.constant 254 : i32
    %160 = tpu.dynamic_rotate %150 by %c254_i32_16 dim 1 : vector<8x256xf32>, i32 -> vector<8x256xf32>
    %161 = vector.broadcast %159 : vector<1x256xf32> to vector<8x256xf32>
    %162 = arith.mulf %161, %160 : vector<8x256xf32>
    %163 = arith.addf %158, %162 : vector<8x256xf32>
    %164 = vector.extract_strided_slice %1 {offsets = [20, 0], sizes = [1, 256], strides = [1, 1]} : vector<40x256xf32> to vector<1x256xf32>
    %165 = vector.broadcast %164 : vector<1x256xf32> to vector<8x256xf32>
    %166 = arith.mulf %165, %163 : vector<8x256xf32>
    %167 = vector.extract_strided_slice %1 {offsets = [19, 0], sizes = [1, 256], strides = [1, 1]} : vector<40x256xf32> to vector<1x256xf32>
    %c32_i32_17 = arith.constant 32 : i32
    %168 = tpu.dynamic_rotate %163 by %c32_i32_17 dim 1 : vector<8x256xf32>, i32 -> vector<8x256xf32>
    %169 = vector.broadcast %167 : vector<1x256xf32> to vector<8x256xf32>
    %170 = arith.mulf %169, %168 : vector<8x256xf32>
    %171 = arith.addf %166, %170 : vector<8x256xf32>
    %172 = vector.extract_strided_slice %1 {offsets = [21, 0], sizes = [1, 256], strides = [1, 1]} : vector<40x256xf32> to vector<1x256xf32>
    %c224_i32_18 = arith.constant 224 : i32
    %173 = tpu.dynamic_rotate %163 by %c224_i32_18 dim 1 : vector<8x256xf32>, i32 -> vector<8x256xf32>
    %174 = vector.broadcast %172 : vector<1x256xf32> to vector<8x256xf32>
    %175 = arith.mulf %174, %173 : vector<8x256xf32>
    %176 = arith.addf %171, %175 : vector<8x256xf32>
    %177 = vector.extract_strided_slice %149 {offsets = [0, 0], sizes = [4, 256], strides = [1, 1]} : vector<8x256xf32> to vector<4x256xf32>
    %178 = vector.extract_strided_slice %0 {offsets = [0, 0], sizes = [4, 256], strides = [1, 1]} : vector<16x256xf32> to vector<4x256xf32>
    %179 = arith.addf %177, %178 : vector<4x256xf32>
    %180 = vector.extract_strided_slice %1 {offsets = [0, 50], sizes = [4, 1], strides = [1, 1]} : vector<40x256xf32> to vector<4x1xf32>
    %181 = vector.broadcast %180 : vector<4x1xf32> to vector<4x256xf32>
    %182 = arith.mulf %181, %179 : vector<4x256xf32>
    %183 = vector.extract_strided_slice %1 {offsets = [0, 51], sizes = [4, 1], strides = [1, 1]} : vector<40x256xf32> to vector<4x1xf32>
    %184 = vector.broadcast %183 : vector<4x1xf32> to vector<4x256xf32>
    %185 = arith.addf %182, %184 : vector<4x256xf32>
    %cst_19 = arith.constant 0.000000e+00 : f32
    %186 = vector.broadcast %cst_19 : f32 to vector<4x256xf32>
    %187 = arith.cmpf oge, %185, %186 : vector<4x256xf32>
    %188 = vector.extract_strided_slice %1 {offsets = [0, 52], sizes = [4, 1], strides = [1, 1]} : vector<40x256xf32> to vector<4x1xf32>
    %189 = vector.broadcast %188 : vector<4x1xf32> to vector<4x256xf32>
    %190 = arith.mulf %189, %185 : vector<4x256xf32>
    %191 = arith.select %187, %185, %190 : vector<4x256xi1>, vector<4x256xf32>
    %c0_20 = arith.constant 0 : index
    %c0_21 = arith.constant 0 : index
    %192 = vector.load %arg3[%c0_20, %c0_21] : memref<16x256xf32, #tpu.memory_space<vmem>>, vector<4x256xf32>
    tpu.vector_store %arg3[%c0_20, %c0_21], %191 {strides = array<i32>} : memref<16x256xf32, #tpu.memory_space<vmem>>, vector<4x256xf32>,
    %193 = vector.extract_strided_slice %176 {offsets = [0, 0], sizes = [4, 256], strides = [1, 1]} : vector<8x256xf32> to vector<4x256xf32>
    %194 = vector.extract_strided_slice %0 {offsets = [4, 0], sizes = [4, 256], strides = [1, 1]} : vector<16x256xf32> to vector<4x256xf32>
    %195 = arith.addf %193, %194 : vector<4x256xf32>
    %196 = vector.extract_strided_slice %1 {offsets = [4, 50], sizes = [4, 1], strides = [1, 1]} : vector<40x256xf32> to vector<4x1xf32>
    %197 = vector.broadcast %196 : vector<4x1xf32> to vector<4x256xf32>
    %198 = arith.mulf %197, %195 : vector<4x256xf32>
    %199 = vector.extract_strided_slice %1 {offsets = [4, 51], sizes = [4, 1], strides = [1, 1]} : vector<40x256xf32> to vector<4x1xf32>
    %200 = vector.broadcast %199 : vector<4x1xf32> to vector<4x256xf32>
    %201 = arith.addf %198, %200 : vector<4x256xf32>
    %cst_22 = arith.constant 0.000000e+00 : f32
    %202 = vector.broadcast %cst_22 : f32 to vector<4x256xf32>
    %203 = arith.cmpf oge, %201, %202 : vector<4x256xf32>
    %204 = vector.extract_strided_slice %1 {offsets = [4, 52], sizes = [4, 1], strides = [1, 1]} : vector<40x256xf32> to vector<4x1xf32>
    %205 = vector.broadcast %204 : vector<4x1xf32> to vector<4x256xf32>
    %206 = arith.mulf %205, %201 : vector<4x256xf32>
    %207 = arith.select %203, %201, %206 : vector<4x256xi1>, vector<4x256xf32>
    %c4 = arith.constant 4 : index
    %c0_23 = arith.constant 0 : index
    %208 = vector.load %arg3[%c4, %c0_23] : memref<16x256xf32, #tpu.memory_space<vmem>>, vector<4x256xf32>
    tpu.vector_store %arg3[%c4, %c0_23], %207 {strides = array<i32>} : memref<16x256xf32, #tpu.memory_space<vmem>>, vector<4x256xf32>,
    %209 = vector.extract_strided_slice %149 {offsets = [4, 0], sizes = [4, 256], strides = [1, 1]} : vector<8x256xf32> to vector<4x256xf32>
    %210 = vector.extract_strided_slice %0 {offsets = [8, 0], sizes = [4, 256], strides = [1, 1]} : vector<16x256xf32> to vector<4x256xf32>
    %211 = arith.addf %209, %210 : vector<4x256xf32>
    %212 = vector.extract_strided_slice %1 {offsets = [8, 50], sizes = [4, 1], strides = [1, 1]} : vector<40x256xf32> to vector<4x1xf32>
    %213 = vector.broadcast %212 : vector<4x1xf32> to vector<4x256xf32>
    %214 = arith.mulf %213, %211 : vector<4x256xf32>
    %215 = vector.extract_strided_slice %1 {offsets = [8, 51], sizes = [4, 1], strides = [1, 1]} : vector<40x256xf32> to vector<4x1xf32>
    %216 = vector.broadcast %215 : vector<4x1xf32> to vector<4x256xf32>
    %217 = arith.addf %214, %216 : vector<4x256xf32>
    %cst_24 = arith.constant 0.000000e+00 : f32
    %218 = vector.broadcast %cst_24 : f32 to vector<4x256xf32>
    %219 = arith.cmpf oge, %217, %218 : vector<4x256xf32>
    %220 = vector.extract_strided_slice %1 {offsets = [8, 52], sizes = [4, 1], strides = [1, 1]} : vector<40x256xf32> to vector<4x1xf32>
    %221 = vector.broadcast %220 : vector<4x1xf32> to vector<4x256xf32>
    %222 = arith.mulf %221, %217 : vector<4x256xf32>
    %223 = arith.select %219, %217, %222 : vector<4x256xi1>, vector<4x256xf32>
    %c8_25 = arith.constant 8 : index
    %c0_26 = arith.constant 0 : index
    %224 = vector.load %arg3[%c8_25, %c0_26] : memref<16x256xf32, #tpu.memory_space<vmem>>, vector<4x256xf32>
    tpu.vector_store %arg3[%c8_25, %c0_26], %223 {strides = array<i32>} : memref<16x256xf32, #tpu.memory_space<vmem>>, vector<4x256xf32>,
    %225 = vector.extract_strided_slice %176 {offsets = [4, 0], sizes = [4, 256], strides = [1, 1]} : vector<8x256xf32> to vector<4x256xf32>
    %226 = vector.extract_strided_slice %0 {offsets = [12, 0], sizes = [4, 256], strides = [1, 1]} : vector<16x256xf32> to vector<4x256xf32>
    %227 = arith.addf %225, %226 : vector<4x256xf32>
    %228 = vector.extract_strided_slice %1 {offsets = [12, 50], sizes = [4, 1], strides = [1, 1]} : vector<40x256xf32> to vector<4x1xf32>
    %229 = vector.broadcast %228 : vector<4x1xf32> to vector<4x256xf32>
    %230 = arith.mulf %229, %227 : vector<4x256xf32>
    %231 = vector.extract_strided_slice %1 {offsets = [12, 51], sizes = [4, 1], strides = [1, 1]} : vector<40x256xf32> to vector<4x1xf32>
    %232 = vector.broadcast %231 : vector<4x1xf32> to vector<4x256xf32>
    %233 = arith.addf %230, %232 : vector<4x256xf32>
    %cst_27 = arith.constant 0.000000e+00 : f32
    %234 = vector.broadcast %cst_27 : f32 to vector<4x256xf32>
    %235 = arith.cmpf oge, %233, %234 : vector<4x256xf32>
    %236 = vector.extract_strided_slice %1 {offsets = [12, 52], sizes = [4, 1], strides = [1, 1]} : vector<40x256xf32> to vector<4x1xf32>
    %237 = vector.broadcast %236 : vector<4x1xf32> to vector<4x256xf32>
    %238 = arith.mulf %237, %233 : vector<4x256xf32>
    %239 = arith.select %235, %233, %238 : vector<4x256xi1>, vector<4x256xf32>
    %c12 = arith.constant 12 : index
    %c0_28 = arith.constant 0 : index
    %240 = vector.load %arg3[%c12, %c0_28] : memref<16x256xf32, #tpu.memory_space<vmem>>, vector<4x256xf32>
    tpu.vector_store %arg3[%c12, %c0_28], %239 {strides = array<i32>} : memref<16x256xf32, #tpu.memory_space<vmem>>, vector<4x256xf32>,
    return
  }
  func.func @transform_0(%arg0: i32) -> (i32, i32) {
    %c0_i32 = arith.constant 0 : i32
    %c0_i32_0 = arith.constant 0 : i32
    %c0_i32_1 = arith.constant 0 : i32
    return %c0_i32, %c0_i32_0 : i32, i32
  }
  func.func @transform_1(%arg0: i32) -> (i32, i32) {
    %c0_i32 = arith.constant 0 : i32
    %c0_i32_0 = arith.constant 0 : i32
    %c0_i32_1 = arith.constant 0 : i32
    return %c0_i32, %c0_i32_0 : i32, i32
  }
  func.func @transform_2(%arg0: i32) -> (i32, i32) {
    %c0_i32 = arith.constant 0 : i32
    %c0_i32_0 = arith.constant 0 : i32
    %c0_i32_1 = arith.constant 0 : i32
    return %c0_i32, %c0_i32_0 : i32, i32
  }
}

</mosaic_0001>

<bundles_post_ra>
// kernel: esp_block_pallas.1
= control target key start
LH: loop header
LB: loop body
LE: loop exit
PB: predicated region body
PF: predicated region fallthrough
CT: control target
= control target key end

     0   :  { %v660_v3 = vmov 42   ;;  %vm23_vm0 = vcmask 130048   ;;  %v661_v6 = vmov 39   ;;  %v662_v7 = vmov 43   ;;  %s666_s19 = smov 1   ;;  %s667_s20 = smov 127   ;;  %s1093_s0 = inlined_call_operand.vmem [shape: f32[16,256], index: 0, kind: input, shape index: {}]   ;;  %s1094_s1 = inlined_call_operand.vmem [shape: f32[40,256], index: 1, kind: input, shape index: {}]   ;;  %s1095_s2 = inlined_call_operand.vmem [shape: f32[16,256], index: 2, kind: output, shape index: {}]  }
   0x1   :  { %v710_v0 = vld [vmem:[%s1093_s0 + $0x10] sm:$0xff]  ;;  %v715_v1 = vld [vmem:[%s1093_s0] sm:$0xff]  ;;  %637 = vset.pattern.permute.xlu2 %v660_v3  ;;  %v726_v4 = vld [vmem:[%s1093_s0 + $0x18] sm:$0xff]  ;;  %v663_v8 = vmov 38   ;;  %v664_v9 = vmov 37   ;;  %v668_v12 = vmov 40   ;;  %v77_v17 = vlaneseq }
   0x2   :  { %1100 = vst [vmem:[#allocation3_spill] sm:$0xff] %v710_v0  ;;  %v720_v2 = vld [vmem:[%s1094_s1] sm:$0xff]  ;;  %41 = vmatpush.msra.mxu0 %v710_v0  ;;  %v731_v5 = vld [vmem:[%s1093_s0 + $0x8] sm:$0xff]  ;;  %61 = vmatpush.msra.mxu1 %v726_v4  ;;  %s665_s0 = smov 112   ;;  %s669_s21 = smov 16   ;;  %v670_v13 = vmov 32  }
   0x3   :  { %1101 = vst [vmem:[#allocation4_spill] sm:$0xff] %v726_v4  ;;  %240 = vperm.xlu2 %637, %v720_v2   ;;  %636 = vset.pattern.permute.xlu1 %v663_v8  ;;  %v671_v14 = vmov 34   ;;  %v672_v15 = vmov 33   ;;  %v763_v19 = vand.u32 127, %v77_v17  ;;  %v768_v20 = vld [vmem:[%s1094_s1 + $0x40] sm:$0xff]  ;;  %v773_v21 = vld [vmem:[%s1094_s1 + $0x48] sm:$0xff] }
   0x4   :  { %42 = vmatpush.msra.mxu0 %v715_v1  ;;  %62 = vmatpush.msra.mxu1 %v731_v5  ;;  %v167_v23 = vperm.slane %v768_v20, 2  ;;  %v168_v24 = vperm.slane %v773_v21, 2  ;;  %v173_v26 = vperm.slane %v768_v20, 3  ;;  %v174_v27 = vperm.slane %v773_v21, 3  ;;  %v825_v54 = vld [vmem:[%s1094_s1 + $0x20] sm:$0xff]  ;;  %v830_v55 = vld [vmem:[%s1094_s1 + $0x28] sm:$0xff] }
   0x5   :  { %597 = vmatmul.msk.f32.vlgmr.msra.gmra.mxu0 %vm23_vm0, %v720_v2  ;;  %598 = vmatmul.msk.f32.vlgmr.msra.gmra.mxu1 %vm23_vm0, %v720_v2  ;;  %vm117_vm1 = vcmp.lt.s32.totalorder %v763_v19, 1  ;;  %vm136_vm2 = vcmp.lt.s32.totalorder %v763_v19, 127  ;;  %v673_v44 = vmov 44   ;;  %v674_v45 = vmov 41   ;;  %s678_s30 = smov 4   ;;  %s679_s3 = smov 64  }
   0x6   :  { %635 = vset.pattern.permute.xlu0 %v664_v9  ;;  %vm79_vm3 = vcmp.lt.s32.totalorder %v763_v19, 16  ;;  %v82_v56 = vperm.slane %v825_v54, 6  ;;  %v83_v57 = vperm.slane %v830_v55, 6  ;;  %vm98_vm4 = vcmp.lt.s32.totalorder %v763_v19, 112  ;;  %s680_s4 = smov 32   ;;  %s681_s5 = smov 2  }
   0x7   :  { %v186_v8 = vperm.slane %v773_v21, 4  ;;  %s682_s6 = smov 96   ;;  %s683_s7 = smov 126   ;;  %vm213_vm5 = vcmp.lt.s32.totalorder %v763_v19, 64  ;;  %vm232_vm6 = vcmp.lt.s32.totalorder %v763_v19, 4  ;;  %vm251_vm7 = vcmp.lt.s32.totalorder %v763_v19, 32 }
   0x8   :  { %s684_s8 = smov 124   ;;  %vm270_vm8 = vcmp.lt.s32.totalorder %v763_v19, 2  ;;  %vm289_vm9 = vcmp.lt.s32.totalorder %v763_v19, 96  ;;  %vm308_vm10 = vcmp.lt.s32.totalorder %v763_v19, 126  ;;  %vm339_vm11 = vcmp.lt.s32.totalorder %v763_v19, 124 }
   0xb   :  { %638 = vset.pattern.permute.xlu2 %v661_v6 }
   0xc   :  { %259 = vperm.xlu2 %638, %v720_v2  }
  0x14   :  { %639 = vset.pattern.permute.xlu2 %v662_v7  ;;  %v185_v7 = vperm.slane %v768_v20, 4 }
  0x15   :  { %278 = vperm.xlu2 %639, %v720_v2  }
  0x1d   :  { %642 = vset.pattern.permute.xlu2 %v672_v15 }
  0x5d   :  { %v805_v40 = vpop.permute.xlu2 %240 }
  0x66   :  { %v807_v41 = vpop.permute.xlu2 %259 }
  0x6f   :  { %v811_v43 = vpop.permute.xlu2 %278 }
  0x82   :  { %v743_v10 = vpop.f32.mrf.mxu0  ;;  %v749_v11 = vpop.f32.mrf.mxu1 }
  0x83   :  { %94 = vrot.lane.b32.xlu2 %v743_v10, %s665_s0  ;;  %113 = vrot.lane.b32.xlu1 %v743_v10, %s666_s19 }
  0x84   :  { %132 = vrot.lane.b32.xlu0 %v743_v10, %s667_s20 }
  0x8b   :  { %115 = vrot.lane.b32.xlu1 %v749_v11, %s666_s19 }
  0x8c   :  { %134 = vrot.lane.b32.xlu0 %v749_v11, %s667_s20 }
  0x93   :  { %221 = vperm.xlu1 %636, %v720_v2  }
  0x94   :  { %204 = vperm.xlu0 %635, %v720_v2  }
  0x9b   :  { %640 = vset.pattern.permute.xlu1 %v668_v12 }
  0x9c   :  { %73 = vrot.lane.b32.xlu0 %v743_v10, %s669_s21  ;;  %297 = vperm.xlu1 %640, %v720_v2  }
  0x9d   :  { %643 = vset.pattern.permute.xlu0 %v673_v44 }
  0xa4   :  { %96 = vrot.lane.b32.xlu0 %v749_v11, %s665_s0  ;;  %641 = vset.pattern.permute.xlu1 %v670_v13 }
  0xa5   :  { %68 = vperm.xlu1 %641, %v720_v2  }
  0xad   :  { %75 = vrot.lane.b32.xlu1 %v749_v11, %s669_s21 }
  0xae   :  { %644 = vset.pattern.permute.xlu1 %v671_v14 }
  0xdd   :  { %v817_v47 = vpop.permute.xlu2 %94 }
  0xf5   :  { %v114_v16 = vpop.permute.xlu1 %113 }
  0xf6   :  { %v133_v18 = vpop.permute.xlu0 %132 }
  0xfd   :  { %v116_v22 = vpop.permute.xlu1 %115 }
  0xfe   :  { %v135_v25 = vpop.permute.xlu0 %134  ;;  %v781_v28 = vsel %vm117_vm1, %v114_v16, %v116_v22  ;;  %v783_v29 = vsel %vm117_vm1, %v116_v22, %v114_v16 }
  0xff   :  { %v785_v30 = vsel %vm136_vm2, %v133_v18, %v135_v25  ;;  %v787_v31 = vsel %vm136_vm2, %v135_v25, %v133_v18  ;;  %v175_v34 = vmul.f32 %v173_v26, %v783_v29  ;;  %v176_v35 = vmul.f32 %v174_v27, %v781_v28 }
 0x100   :  { %v169_v32 = vmul.f32 %v167_v23, %v785_v30  ;;  %v170_v33 = vmul.f32 %v168_v24, %v787_v31  ;;  %v198_v18 = vperm.slane %v773_v21, 5  ;;  %v675_v24 = vmov 45  }
 0x101   :  { %v676_v25 = vmov 35  }
 0x102   :  { %v171_v36 = vadd.f32 %v169_v32, %v743_v10  ;;  %v172_v37 = vadd.f32 %v170_v33, %v749_v11  ;;  %v677_v32 = vmov 36  }
 0x104   :  { %v795_v38 = vadd.f32 %v176_v35, %v172_v37  ;;  %v177_v39 = vadd.f32 %v175_v34, %v171_v36 }
 0x105   :  { %v809_v42 = vpop.permute.xlu1 %221 }
 0x106   :  { %193 = vrot.lane.b32.xlu1 %v795_v38, %s669_s21  ;;  %191 = vrot.lane.b32.xlu0 %v177_v39, %s669_s21  ;;  %v819_v48 = vpop.permute.xlu0 %204 }
 0x107   :  { %179 = vrot.lane.b32.xlu2 %v177_v39, %s665_s0 }
 0x10e   :  { %106 = vperm.xlu1 %644, %v720_v2   ;;  %v813_v46 = vpop.permute.xlu1 %297  ;;  %316 = vperm.xlu0 %643, %v720_v2   ;;  %v74_v51 = vpop.permute.xlu0 %73 }
 0x10f   :  { %181 = vrot.lane.b32.xlu2 %v795_v38, %s665_s0 }
 0x116   :  { %v838_v60 = vpop.permute.xlu0 %96  ;;  %647 = vset.pattern.permute.xlu1 %v675_v24  ;;  %646 = vset.pattern.permute.xlu0 %v676_v25  ;;  %v102_v24 = vperm.slane %v830_v55, 7 }
 0x117   :  { %87 = vperm.xlu2 %642, %v720_v2   ;;  %v69_v49 = vpop.permute.xlu1 %68  ;;  %v99_v25 = vsel %vm98_vm4, %v817_v47, %v838_v60 }
 0x118   :  { %v71_v63 = vmul.f32 %v69_v49, %v743_v10  ;;  %v72_v3 = vmul.f32 %v69_v49, %v749_v11  ;;  %v197_v11 = vperm.slane %v768_v20, 5  ;;  %v688_v49 = vmov 47  }
 0x11f   :  { %645 = vset.pattern.permute.xlu2 %v674_v45  ;;  %v76_v53 = vpop.permute.xlu1 %75  ;;  %v687_v45 = vmov 46  }
 0x120   :  { %328 = vperm.xlu2 %645, %v720_v2   ;;  %v80_v58 = vsel %vm79_vm3, %v74_v51, %v76_v53  ;;  %v81_v59 = vsel %vm79_vm3, %v76_v53, %v74_v51 }
 0x121   :  { %v84_v61 = vmul.f32 %v82_v56, %v81_v59  ;;  %v85_v62 = vmul.f32 %v83_v57, %v80_v58 }
 0x128   :  { %648 = vset.pattern.permute.xlu2 %v677_v32 }
 0x161   :  { %v180_v50 = vpop.permute.xlu2 %179 }
 0x169   :  { %v182_v52 = vpop.permute.xlu2 %181 }
 0x16a   :  { %v183_v13 = vsel %vm98_vm4, %v180_v50, %v182_v52  ;;  %v184_v14 = vsel %vm98_vm4, %v182_v52, %v180_v50  ;;  %v898_v50 = vld [vmem:[%s1094_s1 + $0x10] sm:$0xff] }
 0x16b   :  { %v187_v10 = vmul.f32 %v185_v7, %v183_v13  ;;  %v188_v17 = vmul.f32 %v186_v8, %v184_v14 }
 0x16d   :  { %v189_v33 = vadd.f32 %v187_v10, %v177_v39  ;;  %v190_v34 = vadd.f32 %v188_v17, %v795_v38  ;;  %v685_v38 = vmov 48   ;;  %v686_v39 = vmov 49  }
 0x171   :  { %v88_v6 = vpop.permute.xlu2 %87 }
 0x172   :  { %v90_v9 = vmul.f32 %v88_v6, %v84_v61  ;;  %v91_v12 = vmul.f32 %v88_v6, %v85_v62  ;;  %v917_v6 = vld [vmem:[%s1094_s1 + $0x38] sm:$0xff] }
 0x173   :  { %v217_v8 = vperm.slane %v917_v6, 2  ;;  %v121_v14 = vperm.slane %v917_v6, 0  ;;  %v293_v17 = vperm.slane %v917_v6, 4 }
 0x174   :  { %v849_v15 = vadd.f32 %v90_v9, %v71_v63  ;;  %v851_v16 = vadd.f32 %v91_v12, %v72_v3  ;;  %v912_v3 = vld [vmem:[%s1094_s1 + $0x30] sm:$0xff] }
 0x175   :  { %v216_v7 = vperm.slane %v912_v3, 2  ;;  %v120_v13 = vperm.slane %v912_v3, 0  ;;  %v139_v10 = vperm.slane %v912_v3, 1  ;;  %v235_v32 = vperm.slane %v912_v3, 6 }
 0x178   :  { %v194_v22 = vpop.permute.xlu1 %193  ;;  %v192_v23 = vpop.permute.xlu0 %191 }
 0x179   :  { %v195_v26 = vsel %vm79_vm3, %v192_v23, %v194_v22  ;;  %v196_v27 = vsel %vm79_vm3, %v194_v22, %v192_v23  ;;  %v101_v23 = vperm.slane %v825_v54, 7 }
 0x17a   :  { %v199_v35 = vmul.f32 %v197_v11, %v196_v27  ;;  %v200_v36 = vmul.f32 %v198_v18, %v195_v26  ;;  %v902_v51 = vpop.permute.xlu2 %328  ;;  %v100_v27 = vsel %vm98_vm4, %v838_v60, %v817_v47 }
 0x17c   :  { %v860_v37 = vadd.f32 %v199_v35, %v189_v33  ;;  %v862_v44 = vadd.f32 %v200_v36, %v190_v34  ;;  %v236_v33 = vperm.slane %v917_v6, 6  ;;  %v254_v34 = vperm.slane %v912_v3, 3 }
 0x17e   :  { %228 = vrot.lane.b32.xlu1 %v860_v37, %s678_s30  ;;  %209 = vrot.lane.b32.xlu2 %v860_v37, %s679_s3 }
 0x17f   :  { %211 = vrot.lane.b32.xlu0 %v862_v44, %s679_s3 }
 0x180   :  { %v904_v53 = vpop.permute.xlu0 %316  ;;  %v906_v56 = vpop.permute.xlu1 %106 }
 0x186   :  { %249 = vrot.lane.b32.xlu1 %v862_v44, %s680_s4  ;;  %230 = vrot.lane.b32.xlu2 %v862_v44, %s678_s30 }
 0x187   :  { %266 = vrot.lane.b32.xlu0 %v860_v37, %s681_s5 }
 0x18e   :  { %268 = vrot.lane.b32.xlu1 %v862_v44, %s681_s5  ;;  %247 = vrot.lane.b32.xlu2 %v860_v37, %s680_s4 }
 0x18f   :  { %285 = vrot.lane.b32.xlu0 %v860_v37, %s682_s6 }
 0x196   :  { %287 = vrot.lane.b32.xlu1 %v862_v44, %s682_s6  ;;  %304 = vrot.lane.b32.xlu2 %v860_v37, %s683_s7 }
 0x197   :  { %306 = vrot.lane.b32.xlu0 %v862_v44, %s683_s7 }
 0x19e   :  { %347 = vperm.xlu1 %647, %v720_v2   ;;  %144 = vperm.xlu2 %648, %v720_v2  }
 0x19f   :  { %125 = vperm.xlu0 %646, %v720_v2  }
 0x1a6   :  { %335 = vrot.lane.b32.xlu1 %v860_v37, %s684_s8  ;;  %337 = vrot.lane.b32.xlu2 %v862_v44, %s684_s8 }
 0x1a7   :  { %649 = vset.pattern.permute.xlu1 %v685_v38  ;;  %651 = vset.pattern.permute.xlu0 %v686_v39  ;;  %v255_v38 = vperm.slane %v917_v6, 3 }
 0x1a8   :  { %363 = vperm.xlu0 %651, %v720_v2   ;;  %650 = vset.pattern.permute.xlu2 %v687_v45 }
 0x1ae   :  { %355 = vperm.xlu1 %649, %v720_v2   ;;  %152 = vperm.xlu2 %650, %v720_v2  }
 0x1b6   :  { %652 = vset.pattern.permute.xlu1 %v688_v49  ;;  %379 = vrot.lane.b32.xlu2 %v720_v2, %s665_s0 }
 0x1b7   :  { %160 = vperm.xlu1 %652, %v720_v2  }
 0x1bf   :  { %381 = vrot.lane.b32.xlu1 %v898_v50, %s665_s0 }
 0x1d8   :  { %v210_v52 = vpop.permute.xlu2 %209 }
 0x1e0   :  { %v231_v57 = vpop.permute.xlu2 %230 }
 0x1e8   :  { %v248_v63 = vpop.permute.xlu2 %247 }
 0x1f0   :  { %v229_v58 = vpop.permute.xlu1 %228  ;;  %v305_v39 = vpop.permute.xlu2 %304 }
 0x1f1   :  { %v212_v59 = vpop.permute.xlu0 %211  ;;  %v233_v35 = vsel %vm232_vm6, %v229_v58, %v231_v57  ;;  %v234_v36 = vsel %vm232_vm6, %v231_v57, %v229_v58  ;;  %v273_v57 = vperm.slane %v912_v3, 7  ;;  %v274_v58 = vperm.slane %v917_v6, 7 }
 0x1f2   :  { %v921_v9 = vsel %vm213_vm5, %v210_v52, %v212_v59  ;;  %v923_v12 = vsel %vm213_vm5, %v212_v59, %v210_v52  ;;  %v103_v52 = vmul.f32 %v101_v23, %v99_v25  ;;  %v207_v59 = vmul.f32 %v819_v48, %v860_v37 }
 0x1f3   :  { %v218_v11 = vmul.f32 %v216_v7, %v923_v12  ;;  %v219_v18 = vmul.f32 %v217_v8, %v921_v9  ;;  %v208_v7 = vmul.f32 %v819_v48, %v862_v44  ;;  %v292_v25 = vperm.slane %v912_v3, 4 }
 0x1f5   :  { %v224_v45 = vmul.f32 %v809_v42, %v218_v11  ;;  %v225_v49 = vmul.f32 %v809_v42, %v219_v18 }
 0x1f7   :  { %v226_v37 = vadd.f32 %v224_v45, %v207_v59  ;;  %v227_v23 = vadd.f32 %v225_v49, %v208_v7  ;;  %v324_v7 = vperm.slane %v917_v6, 5 }
 0x1f8   :  { %v250_v61 = vpop.permute.xlu1 %249 }
 0x1f9   :  { %v267_v62 = vpop.permute.xlu0 %266  ;;  %v252_v47 = vsel %vm251_vm7, %v248_v63, %v250_v61  ;;  %v253_v60 = vsel %vm251_vm7, %v250_v61, %v248_v63  ;;  %v237_v61 = vmul.f32 %v235_v32, %v234_v36  ;;  %v238_v63 = vmul.f32 %v236_v33, %v233_v35 }
 0x1fa   :  { %v256_v11 = vmul.f32 %v254_v34, %v253_v60  ;;  %v257_v18 = vmul.f32 %v255_v38, %v252_v47  ;;  %v122_v32 = vmul.f32 %v120_v13, %v783_v29  ;;  %v123_v33 = vmul.f32 %v121_v14, %v781_v28 }
 0x1fb   :  { %v104_v34 = vmul.f32 %v102_v24, %v100_v27  ;;  %v109_v35 = vmul.f32 %v906_v56, %v103_v52  ;;  %v243_v36 = vmul.f32 %v805_v40, %v237_v61  ;;  %v244_v38 = vmul.f32 %v805_v40, %v238_v63 }
 0x1fc   :  { %v262_v45 = vmul.f32 %v807_v41, %v256_v11  ;;  %v263_v49 = vmul.f32 %v807_v41, %v257_v18  ;;  %v141_v24 = vmul.f32 %v139_v10, %v785_v30  ;;  %v323_v40 = vperm.slane %v912_v3, 5 }
 0x1fd   :  { %v110_v47 = vmul.f32 %v906_v56, %v104_v34  ;;  %v245_v29 = vadd.f32 %v243_v36, %v226_v37  ;;  %v246_v13 = vadd.f32 %v244_v38, %v227_v23  ;;  %v311_v27 = vperm.slane %v768_v20, 0 }
 0x1fe   :  { %v312_v41 = vperm.slane %v773_v21, 0  ;;  %v111_v30 = vadd.f32 %v109_v35, %v849_v15 }
 0x1ff   :  { %v264_v56 = vadd.f32 %v262_v45, %v245_v29 }
 0x200   :  { %v269_v22 = vpop.permute.xlu1 %268 }
 0x201   :  { %v286_v26 = vpop.permute.xlu0 %285  ;;  %v271_v42 = vsel %vm270_vm8, %v267_v62, %v269_v22  ;;  %v272_v8 = vsel %vm270_vm8, %v269_v22, %v267_v62 }
 0x202   :  { %v275_v48 = vmul.f32 %v273_v57, %v272_v8  ;;  %v276_v44 = vmul.f32 %v274_v58, %v271_v42  ;;  %v112_v58 = vadd.f32 %v110_v47, %v851_v16  ;;  %v342_v16 = vperm.slane %v768_v20, 1 }
 0x204   :  { %v281_v28 = vmul.f32 %v811_v43, %v275_v48  ;;  %v282_v14 = vmul.f32 %v811_v43, %v276_v44  ;;  %v1102_v43 = vperm.slane %v917_v6, 1  ;;  %v326_v44 = vmul.f32 %v324_v7, %v923_v12 }
 0x205   :  { %v343_v6 = vperm.slane %v773_v21, 1 }
 0x206   :  { %v142_v59 = vmul.f32 %v1102_v43, %v787_v31  ;;  %v283_v42 = vadd.f32 %v281_v28, %v264_v56  ;;  %v325_v31 = vmul.f32 %v323_v40, %v921_v9 }
 0x208   :  { %v288_v4 = vpop.permute.xlu1 %287  ;;  %v331_v12 = vmul.f32 %v902_v51, %v325_v31  ;;  %v443_v31 = vperm.slane %v825_v54, 0 }
 0x209   :  { %v290_v0 = vsel %vm289_vm9, %v286_v26, %v288_v4  ;;  %v291_v62 = vsel %vm289_vm9, %v288_v4, %v286_v26  ;;  %v307_v22 = vpop.permute.xlu0 %306  ;;  %v145_v26 = vpop.permute.xlu2 %144 }
 0x20a   :  { %v294_v60 = vmul.f32 %v292_v25, %v290_v0  ;;  %v295_v4 = vmul.f32 %v293_v17, %v291_v62  ;;  %v265_v0 = vadd.f32 %v263_v49, %v246_v13  ;;  %v309_v17 = vsel %vm308_vm10, %v305_v39, %v307_v22 }
 0x20b   :  { %v310_v52 = vsel %vm308_vm10, %v307_v22, %v305_v39  ;;  %v313_v63 = vmul.f32 %v311_v27, %v309_v17  ;;  %v147_v37 = vmul.f32 %v145_v26, %v141_v24  ;;  %v148_v15 = vmul.f32 %v145_v26, %v142_v59 }
 0x20c   :  { %v300_v3 = vmul.f32 %v813_v46, %v294_v60  ;;  %v301_v10 = vmul.f32 %v813_v46, %v295_v4  ;;  %v284_v8 = vadd.f32 %v282_v14, %v265_v0  ;;  %v314_v39 = vmul.f32 %v312_v41, %v310_v52 }
 0x20d   :  { %v319_v62 = vmul.f32 %v904_v53, %v313_v63  ;;  %v332_v49 = vmul.f32 %v902_v51, %v326_v44  ;;  %v690_v63 = vmov 51  }
 0x20e   :  { %v302_v23 = vadd.f32 %v300_v3, %v283_v42  ;;  %v303_v25 = vadd.f32 %v301_v10, %v284_v8  ;;  %v320_v22 = vmul.f32 %v904_v53, %v314_v39  ;;  %655 = vset.pattern.permute.xlu0 %v690_v63 }
 0x210   :  { %v348_v57 = vpop.permute.xlu1 %347  ;;  %v321_v34 = vadd.f32 %v319_v62, %v302_v23  ;;  %v322_v35 = vadd.f32 %v320_v22, %v303_v25  ;;  %v455_v25 = vperm.slane %v825_v54, 2 }
 0x211   :  { %v126_v61 = vpop.permute.xlu0 %125 }
 0x212   :  { %v128_v11 = vmul.f32 %v126_v61, %v122_v32  ;;  %v129_v18 = vmul.f32 %v126_v61, %v123_v33  ;;  %v338_v33 = vpop.permute.xlu2 %337  ;;  %v333_v4 = vadd.f32 %v331_v12, %v321_v34  ;;  %v334_v29 = vadd.f32 %v332_v49, %v322_v35 }
 0x213   :  { %v689_v61 = vmov 50   ;;  %v691_v49 = vmov 52  }
 0x214   :  { %v130_v48 = vadd.f32 %v128_v11, %v111_v30  ;;  %v131_v46 = vadd.f32 %v129_v18, %v112_v58  ;;  %653 = vset.pattern.permute.xlu1 %v689_v61  ;;  %654 = vset.pattern.permute.xlu2 %v689_v61  ;;  %v433_v11 = vperm.slane %v825_v54, 1  ;;  %v434_v18 = vperm.slane %v830_v55, 1 }
 0x216   :  { %v149_v32 = vadd.f32 %v147_v37, %v130_v48  ;;  %v150_v9 = vadd.f32 %v148_v15, %v131_v46  ;;  %v444_v37 = vperm.slane %v830_v55, 0  ;;  %v456_v48 = vperm.slane %v830_v55, 2 }
 0x218   :  { %v336_v36 = vpop.permute.xlu1 %335 }
 0x219   :  { %v340_v38 = vsel %vm339_vm11, %v336_v36, %v338_v33  ;;  %v341_v45 = vsel %vm339_vm11, %v338_v33, %v336_v36 }
 0x21a   :  { %v344_v47 = vmul.f32 %v342_v16, %v340_v38  ;;  %v345_v20 = vmul.f32 %v343_v6, %v341_v45  ;;  %v364_v14 = vpop.permute.xlu0 %363  ;;  %v153_v26 = vpop.permute.xlu2 %152 }
 0x21b   :  { %v155_v51 = vadd.f32 %v153_v26, %v149_v32  ;;  %v156_v17 = vadd.f32 %v153_v26, %v150_v9 }
 0x21c   :  { %v350_v60 = vmul.f32 %v348_v57, %v344_v47  ;;  %v351_v21 = vmul.f32 %v348_v57, %v345_v20 }
 0x21d   :  { %vm157_vm14 = vcmp.ge.f32.partialorder %v155_v51, 0.0  ;;  %vm158_vm15 = vcmp.ge.f32.partialorder %v156_v17, 0.0 }
 0x21e   :  { %v352_v13 = vadd.f32 %v350_v60, %v333_v4  ;;  %v353_v53 = vadd.f32 %v351_v21, %v334_v29  ;;  %v471_v21 = vperm.slane %v825_v54, 3  ;;  %v472_v4 = vperm.slane %v830_v55, 3 }
 0x220   :  { %v356_v28 = vpop.permute.xlu1 %355 }
 0x221   :  { %v358_v24 = vadd.f32 %v356_v28, %v352_v13  ;;  %v359_v40 = vadd.f32 %v356_v28, %v353_v53  ;;  %v461_v53 = vperm.slane %v825_v54, 4 }
 0x222   :  { %v380_v30 = vpop.permute.xlu2 %379 }
 0x223   :  { %v366_v27 = vmul.f32 %v364_v14, %v358_v24  ;;  %v367_v41 = vmul.f32 %v364_v14, %v359_v40  ;;  %vm360_vm12 = vcmp.ge.f32.partialorder %v358_v24, 0.0  ;;  %vm361_vm13 = vcmp.ge.f32.partialorder %v359_v40, 0.0 }
 0x225   :  { %v368_v56 = vsel %vm360_vm12, %v358_v24, %v366_v27  ;;  %v369_v0 = vsel %vm361_vm13, %v359_v40, %v367_v41  ;;  %v484_v24 = vperm.slane %v830_v55, 5  ;;  %v517_v27 = vrot.slane %v715_v1, 4 }
 0x226   :  { %401 = vmatpush.msra.mxu2 %v368_v56  ;;  %424 = vmatpush.msra.mxu3 %v369_v0  ;;  %v518_v41 = vrot.slane %v731_v5, 4 }
 0x229   :  { %v161_v52 = vpop.permute.xlu1 %160 }
 0x22a   :  { %v163_v43 = vmul.f32 %v161_v52, %v155_v51  ;;  %v164_v59 = vmul.f32 %v161_v52, %v156_v17 }
 0x22c   :  { %v165_v3 = vsel %vm157_vm14, %v155_v51, %v163_v43  ;;  %v166_v10 = vsel %vm158_vm15, %v156_v17, %v164_v59  ;;  %v1103_v17 = vld [vmem:[#allocation3_spill] sm:$0xff]  ;;  %v1104_v43 = vld [vmem:[#allocation4_spill] sm:$0xff] }
 0x22d   :  { %402 = vmatpush.msra.mxu2 %v165_v3  ;;  %425 = vmatpush.msra.mxu3 %v166_v10  ;;  %v543_v52 = vrot.slane %v1103_v17, 4  ;;  %v544_v59 = vrot.slane %v1104_v43, 4 }
 0x22e   :  { %599 = vmatmul.msk.f32.vlgmr.msra.gmra.mxu2 %vm23_vm0, %v380_v30  ;;  %601 = vmatmul.msk.f32.vlgmr.msra.gmra.mxu3 %vm23_vm0, %v380_v30 }
 0x231   :  { %v382_v57 = vpop.permute.xlu1 %381 }
 0x236   :  { %600 = vmatmul.msk.f32.gmra.mxu2 %vm23_vm0, %v382_v57  ;;  %602 = vmatmul.msk.f32.gmra.mxu3 %vm23_vm0, %v382_v57 }
 0x2b1   :  { %v1011_v58 = vpop.f32.mrf.mxu2  ;;  %v1013_v7 = vpop.f32.mrf.mxu3 }
 0x2b2   :  { %v489_v61 = vadd.f32 %v1011_v58, %v715_v1 }
 0x2b9   :  { %v407_v42 = vpop.f32.mrf.mxu2  ;;  %v430_v8 = vpop.f32.mrf.mxu3 }
 0x2ba   :  { %439 = vrot.lane.b32.xlu0 %v430_v8, %s681_s5  ;;  %449 = vrot.lane.b32.xlu1 %v407_v42, %s683_s7  ;;  %v435_v22 = vmul.f32 %v433_v11, %v407_v42  ;;  %v436_v32 = vmul.f32 %v434_v18, %v430_v8  ;;  %v548_v11 = vadd.f32 %v544_v59, %v1013_v7 }
 0x2bb   :  { %437 = vrot.lane.b32.xlu2 %v407_v42, %s681_s5 }
 0x2c3   :  { %451 = vrot.lane.b32.xlu2 %v430_v8, %s683_s7 }
 0x315   :  { %v438_v39 = vpop.permute.xlu2 %437 }
 0x31d   :  { %v452_v15 = vpop.permute.xlu2 %451 }
 0x32c   :  { %v440_v23 = vpop.permute.xlu0 %439  ;;  %v450_v46 = vpop.permute.xlu1 %449 }
 0x32d   :  { %v441_v44 = vsel %vm270_vm8, %v438_v39, %v440_v23  ;;  %v442_v16 = vsel %vm270_vm8, %v440_v23, %v438_v39  ;;  %v453_v6 = vsel %vm308_vm10, %v450_v46, %v452_v15  ;;  %v454_v62 = vsel %vm308_vm10, %v452_v15, %v450_v46 }
 0x32e   :  { %v445_v9 = vmul.f32 %v443_v31, %v442_v16  ;;  %v446_v33 = vmul.f32 %v444_v37, %v441_v44  ;;  %v457_v36 = vmul.f32 %v455_v25, %v453_v6  ;;  %v458_v38 = vmul.f32 %v456_v48, %v454_v62 }
 0x32f   :  { %v490_v39 = vadd.f32 %v1013_v7, %v731_v5  ;;  %v556_v62 = vrot.slane %v548_v11, 4 }
 0x330   :  { %v447_v34 = vadd.f32 %v445_v9, %v435_v22  ;;  %v448_v35 = vadd.f32 %v446_v33, %v436_v32 }
 0x332   :  { %v460_v45 = vadd.f32 %v458_v38, %v448_v35  ;;  %v459_v12 = vadd.f32 %v457_v36, %v447_v34 }
 0x334   :  { %467 = vrot.lane.b32.xlu1 %v460_v45, %s680_s4  ;;  %477 = vrot.lane.b32.xlu2 %v459_v12, %s682_s6  ;;  %v463_v0 = vmul.f32 %v461_v53, %v459_v12 }
 0x335   :  { %465 = vrot.lane.b32.xlu0 %v459_v12, %s680_s4 }
 0x33c   :  { %492 = vperm.xlu1 %653, %v720_v2   ;;  %550 = vperm.xlu2 %654, %v898_v50  }
 0x33d   :  { %479 = vrot.lane.b32.xlu0 %v460_v45, %s682_s6 }
 0x344   :  { %656 = vset.pattern.permute.xlu1 %v690_v63  ;;  %657 = vset.pattern.permute.xlu2 %v691_v49  ;;  %v547_v63 = vadd.f32 %v543_v52, %v1011_v58 }
 0x345   :  { %498 = vperm.xlu0 %655, %v720_v2   ;;  %562 = vperm.xlu1 %656, %v898_v50  }
 0x346   :  { %506 = vperm.xlu2 %657, %v720_v2   ;;  %v462_v2 = vperm.slane %v830_v55, 4  ;;  %v555_v16 = vrot.slane %v547_v63, 4 }
 0x348   :  { %v464_v56 = vmul.f32 %v462_v2, %v460_v45 }
 0x34d   :  { %658 = vset.pattern.permute.xlu1 %v691_v49  ;;  %659 = vset.pattern.permute.xlu0 %v691_v49 }
 0x34e   :  { %570 = vperm.xlu1 %658, %v898_v50   ;;  %v483_v50 = vperm.slane %v825_v54, 5 }
 0x38e   :  { %v478_v47 = vpop.permute.xlu2 %477 }
 0x396   :  { %v551_v40 = vpop.permute.xlu2 %550 }
 0x397   :  { %v559_v36 = vmul.f32 %v555_v16, %v551_v40  ;;  %v560_v38 = vmul.f32 %v556_v62, %v551_v40 }
 0x3a0   :  { %v507_v23 = vpop.permute.xlu2 %506 }
 0x3a6   :  { %v468_v20 = vpop.permute.xlu1 %467 }
 0x3a7   :  { %v466_v60 = vpop.permute.xlu0 %465 }
 0x3a8   :  { %v469_v29 = vsel %vm251_vm7, %v466_v60, %v468_v20  ;;  %v470_v13 = vsel %vm251_vm7, %v468_v20, %v466_v60 }
 0x3a9   :  { %v473_v28 = vmul.f32 %v471_v21, %v470_v13  ;;  %v474_v14 = vmul.f32 %v472_v4, %v469_v29 }
 0x3ab   :  { %v475_v55 = vadd.f32 %v473_v28, %v463_v0  ;;  %v476_v3 = vadd.f32 %v474_v14, %v464_v56 }
 0x3ae   :  { %v493_v26 = vpop.permute.xlu1 %492 }
 0x3af   :  { %v480_v51 = vpop.permute.xlu0 %479  ;;  %v495_v37 = vmul.f32 %v493_v26, %v489_v61  ;;  %v496_v15 = vmul.f32 %v493_v26, %v490_v39 }
 0x3b0   :  { %v481_v30 = vsel %vm289_vm9, %v478_v47, %v480_v51  ;;  %v482_v54 = vsel %vm289_vm9, %v480_v51, %v478_v47 }
 0x3b1   :  { %v485_v10 = vmul.f32 %v483_v50, %v481_v30  ;;  %v486_v57 = vmul.f32 %v484_v24, %v482_v54 }
 0x3b3   :  { %v487_v42 = vadd.f32 %v485_v10, %v475_v55  ;;  %v488_v8 = vadd.f32 %v486_v57, %v476_v3 }
 0x3b5   :  { %v521_v18 = vadd.f32 %v517_v27, %v487_v42  ;;  %v522_v31 = vadd.f32 %v518_v41, %v488_v8  ;;  %v579_v19 = vadd.f32 %v487_v42, %v1103_v17  ;;  %v580_v46 = vadd.f32 %v488_v8, %v1104_v43 }
 0x3b7   :  { %v525_v25 = vrot.slane %v521_v18, 4  ;;  %v526_v48 = vrot.slane %v522_v31, 4  ;;  %v499_v44 = vpop.permute.xlu0 %498  ;;  %v563_v1 = vpop.permute.xlu1 %562  ;;  %v581_v7 = vmul.f32 %v579_v19, %v551_v40  ;;  %v582_v35 = vmul.f32 %v580_v46, %v551_v40 }
 0x3b8   :  { %v501_v58 = vadd.f32 %v499_v44, %v495_v37  ;;  %v502_v6 = vadd.f32 %v499_v44, %v496_v15  ;;  %v565_v20 = vadd.f32 %v563_v1, %v559_v36  ;;  %v566_v60 = vadd.f32 %v563_v1, %v560_v38 }
 0x3b9   :  { %v530_v5 = vmul.f32 %v526_v48, %v493_v26  ;;  %v529_v22 = vmul.f32 %v525_v25, %v493_v26  ;;  %v583_v21 = vadd.f32 %v581_v7, %v563_v1  ;;  %v584_v4 = vadd.f32 %v582_v35, %v563_v1 }
 0x3ba   :  { %vm503_vm0 = vcmp.ge.f32.partialorder %v501_v58, 0.0  ;;  %vm504_vm1 = vcmp.ge.f32.partialorder %v502_v6, 0.0  ;;  %v509_v32 = vmul.f32 %v507_v23, %v501_v58  ;;  %v510_v9 = vmul.f32 %v507_v23, %v502_v6 }
 0x3bb   :  { %v531_v33 = vadd.f32 %v529_v22, %v499_v44  ;;  %v532_v34 = vadd.f32 %v530_v5, %v499_v44  ;;  %vm567_vm4 = vcmp.ge.f32.partialorder %v565_v20, 0.0  ;;  %vm568_vm5 = vcmp.ge.f32.partialorder %v566_v60, 0.0 }
 0x3bc   :  { %v511_v45 = vsel %vm503_vm0, %v501_v58, %v509_v32  ;;  %v512_v12 = vsel %vm504_vm1, %v502_v6, %v510_v9  ;;  %vm585_vm6 = vcmp.ge.f32.partialorder %v583_v21, 0.0  ;;  %vm586_vm7 = vcmp.ge.f32.partialorder %v584_v4, 0.0 }
 0x3bd   :  { %vm533_vm2 = vcmp.ge.f32.partialorder %v531_v33, 0.0  ;;  %vm534_vm3 = vcmp.ge.f32.partialorder %v532_v34, 0.0  ;;  %513 = vst [vmem:[%s1095_s2] sm:$0xf] %v511_v45  ;;  %v535_v49 = vmul.f32 %v531_v33, %v507_v23  ;;  %v536_v47 = vmul.f32 %v532_v34, %v507_v23 }
 0x3be   :  { %514 = vst [vmem:[%s1095_s2 + $0x8] sm:$0xf] %v512_v12 }
 0x3bf   :  { %v537_v29 = vsel %vm533_vm2, %v531_v33, %v535_v49  ;;  %v538_v13 = vsel %vm534_vm3, %v532_v34, %v536_v47 }
 0x3c0   :  { %539 = vst [vmem:[%s1095_s2] sm:$0xf0] %v537_v29  ;;  %v571_v53 = vpop.permute.xlu1 %570 }
 0x3c1   :  { %540 = vst [vmem:[%s1095_s2 + $0x8] sm:$0xf0] %v538_v13  ;;  %v573_v2 = vmul.f32 %v571_v53, %v565_v20  ;;  %v574_v28 = vmul.f32 %v571_v53, %v566_v60  ;;  %v587_v14 = vmul.f32 %v583_v21, %v571_v53  ;;  %v588_v50 = vmul.f32 %v584_v4, %v571_v53 }
 0x3c3   :  { %v575_v24 = vsel %vm567_vm4, %v565_v20, %v573_v2  ;;  %v576_v40 = vsel %vm568_vm5, %v566_v60, %v574_v28  ;;  %v589_v26 = vsel %vm585_vm6, %v583_v21, %v587_v14  ;;  %v590_v27 = vsel %vm586_vm7, %v584_v4, %v588_v50 }
 0x3c4   :  { %577 = vst [vmem:[%s1095_s2 + $0x10] sm:$0xf] %v575_v24 }
 0x3c5   :  { %578 = vst [vmem:[%s1095_s2 + $0x18] sm:$0xf] %v576_v40 }
 0x3c6   :  { %591 = vst [vmem:[%s1095_s2 + $0x10] sm:$0xf0] %v589_v26 }
 0x3c7   :  { %592 = vst [vmem:[%s1095_s2 + $0x18] sm:$0xf0] %v590_v27 }

</bundles_post_ra>
